<compile_context>
chip_gen: v7x
topology: tpu7x:2x2x1
jax: 0.10.0
libtpu: 0.0.40
codegen_flags: <defaults>
</compile_context>

<pallas_src>
import jax
import jax.numpy as jnp
from jax.experimental import pallas as pl
from jax.experimental.pallas import tpu as pltpu


def gcn_kernel(a_ref, h0_ref, w2_ref, b2_ref, out_ref):
    """Processes Bt batch elements per grid step.

    a_ref  : (Bt, N, N)   bf16 normalized adjacency block
    h0_ref : (Bt, N, H1)  bf16 first-layer pre-activation (W1[x] + b1)
    w2_ref : (H1, H2p)    bf16 second GCN weight (H2 padded to 128 lanes)
    b2_ref : (1, H2p)     f32  second bias (padded)
    out_ref: (Bt, H2p)    f32  mean over nodes of the second layer output
    """
    bt, n, _ = a_ref.shape
    h2p = w2_ref.shape[1]

    a = a_ref[...]                                   # (Bt, N, N)  bf16
    h0 = h0_ref[...]                                 # (Bt, N, H1) bf16

    # layer 1: relu(A @ (X W1 + b1)); X W1 + b1 was precomputed as a gather.
    h1 = jnp.einsum("bij,bjh->bih", a, h0,
                    preferred_element_type=jnp.float32)
    h1 = jnp.maximum(h1, 0.0)

    # layer 2 weight matmul on flattened (Bt*N, H1) rows (fills MXU rows).
    h1f = h1.reshape(bt * n, -1).astype(jnp.bfloat16)
    h2 = jnp.dot(h1f, w2_ref[...],
                 preferred_element_type=jnp.float32) + b2_ref[...]
    h2 = h2.reshape(bt, n, h2p).astype(jnp.bfloat16)

    # layer 2 propagation: relu(A @ (H W2 + b2))
    h3 = jnp.einsum("bij,bjh->bih", a, h2,
                    preferred_element_type=jnp.float32)
    h3 = jnp.maximum(h3, 0.0)

    # mean over nodes as a (1, N) @ (N, H2p) matvec per batch element (MXU,
    # avoids the cross-sublane XLU reduction).
    mean_vec = jnp.full((bt, 1, n), 1.0 / n, dtype=jnp.float32)
    out = jnp.einsum("bon,bnh->boh", mean_vec, h3,
                     preferred_element_type=jnp.float32)
    out_ref[...] = out[:, 0, :]


def gcn_forward(a_hat, x_idx, w1, b1, w2, b2, *, block_b=16):
    B, N, _ = a_hat.shape
    E, H1 = w1.shape
    _, H2 = w2.shape

    # ---- glue (plain JAX, outside the kernel) ----
    # node_features is the identity, so node_features[X] @ W1 == W1[X]; fold b1.
    h0 = w1[x_idx.reshape(B * N)].reshape(B, N, H1) + b1[None, None, :]

    # bf16 MXU operands (accumulation stays f32 inside the kernel).
    a_bf = a_hat.astype(jnp.bfloat16)
    h0_bf = h0.astype(jnp.bfloat16)

    # Pad output feature dim to a full 128-lane tile (lane-dense stores).
    H2p = max(128, pl.cdiv(H2, 128) * 128)
    w2p = jnp.zeros((H1, H2p), jnp.float32).at[:, :H2].set(w2).astype(jnp.bfloat16)
    b2p = jnp.zeros((1, H2p), jnp.float32).at[0, :H2].set(b2)

    # Batch blocking: Bt elements per grid step, pad B up to a multiple of Bt.
    Bt = max(1, min(block_b, B))
    Bp = pl.cdiv(B, Bt) * Bt
    if Bp != B:
        pad = Bp - B
        a_bf = jnp.pad(a_bf, ((0, pad), (0, 0), (0, 0)))
        h0_bf = jnp.pad(h0_bf, ((0, pad), (0, 0), (0, 0)))

    out = pl.pallas_call(
        gcn_kernel,
        out_shape=jax.ShapeDtypeStruct((Bp, H2p), jnp.float32),
        grid_spec=pltpu.PrefetchScalarGridSpec(
            num_scalar_prefetch=0,
            grid=(Bp // Bt,),
            in_specs=[
                pl.BlockSpec((Bt, N, N), lambda b: (b, 0, 0)),    # A_hat block
                pl.BlockSpec((Bt, N, H1), lambda b: (b, 0, 0)),   # W1[x]+b1
                pl.BlockSpec((H1, H2p), lambda b: (0, 0)),        # W2 (shared)
                pl.BlockSpec((1, H2p), lambda b: (0, 0)),         # b2 (shared)
            ],
            out_specs=pl.BlockSpec((Bt, H2p), lambda b: (b, 0)),
        ),
        compiler_params=pltpu.CompilerParams(
            dimension_semantics=("parallel",),
            vmem_limit_bytes=32 * 1024 * 1024,
        ),
    )(a_bf, h0_bf, w2p, b2p)

    return out[:B, :H2]


def gcn_reference(a_hat, x_idx, w1, b1, w2, b2):
    """Pure-JAX (f32) reference of the PyTorch forward pass."""
    B, N, _ = a_hat.shape
    E = w1.shape[0]
    x = jax.nn.one_hot(x_idx.reshape(-1), E, dtype=jnp.float32)     # (B*N, E)
    h = x @ w1 + b1
    h = h.reshape(B, N, -1)
    h = jax.nn.relu(jnp.einsum("bij,bjh->bih", a_hat, h))
    h = h.reshape(B * N, -1) @ w2 + b2
    h = h.reshape(B, N, -1)
    h = jax.nn.relu(jnp.einsum("bij,bjh->bih", a_hat, h))
    return h.mean(axis=1)


if __name__ == "__main__":
    # Small shapes consistent with the module:
    #   E  = len(entity2id) = input_dim = 16
    #   H1 = hidden_dim_list[0] = 32, H2 = hidden_dim_list[1] = 32
    #   A_hat: (B, N, N) with B=32, N=8.  B is sized so the batch-blocked grid
    #   has 2 steps of Bt=16 (Bt*N = 128 MXU rows; both v7x cores get work).
    B, N, E, H1, H2 = 32, 8, 16, 32, 32

    key = jax.random.PRNGKey(0)
    k_w1, k_b1, k_w2, k_b2, k_a, k_x = jax.random.split(key, 6)

    # PyTorch init: normal_(0, var) with var = 2 / (fan_in + fan_out) used as std.
    std1 = 2.0 / (E + H1)
    std2 = 2.0 / (H1 + H2)
    w1 = std1 * jax.random.normal(k_w1, (E, H1), dtype=jnp.float32)
    b1 = std1 * jax.random.normal(k_b1, (H1,), dtype=jnp.float32)
    w2 = std2 * jax.random.normal(k_w2, (H1, H2), dtype=jnp.float32)
    b2 = std2 * jax.random.normal(k_b2, (H2,), dtype=jnp.float32)

    # Deterministic A_hat: random adjacency + self loops, row-normalized.
    adj = (jax.random.uniform(k_a, (B, N, N)) > 0.5).astype(jnp.float32)
    adj = adj + jnp.eye(N, dtype=jnp.float32)[None]
    a_hat = adj / jnp.sum(adj, axis=-1, keepdims=True)

    # Entity indices (the PyTorch module casts X to long and gathers one-hots).
    x_idx = jax.random.randint(k_x, (B, N), 0, E, dtype=jnp.int32)

    out = gcn_forward(a_hat, x_idx, w1, b1, w2, b2, block_b=16)
    out = jax.block_until_ready(out)

    ref = gcn_reference(a_hat, x_idx, w1, b1, w2, b2)
    assert out.shape == (B, H2)
    # bf16 MXU operands with f32 accumulation -> compare at bf16-level tolerance.
    assert jnp.allclose(out, ref, atol=3e-3, rtol=2e-2), "mismatch vs reference"

    print("KERNEL_OK")
</pallas_src>

<mosaic_0001>
module attributes {stable_mosaic.version = 11 : i64} {
  func.func @gcn_kernel(%arg0: i32, %arg1: memref<16x8x8xbf16, #tpu.memory_space<vmem>>, %arg2: memref<16x8x32xbf16, #tpu.memory_space<vmem>>, %arg3: memref<32x128xbf16, #tpu.memory_space<vmem>>, %arg4: memref<1x128xf32, #tpu.memory_space<vmem>>, %arg5: memref<16x128xf32, #tpu.memory_space<vmem>>) attributes {dimension_semantics = [#tpu.dimension_semantics<parallel>], iteration_bounds = array<i64: 2>, scalar_prefetch = 0 : i64, scratch_operands = 0 : i64, tpu.core_type = #tpu.core_type<tc>, window_params = [{transform_indices = @transform_0, window_bounds = array<i64: 16, 8, 8>}, {transform_indices = @transform_1, window_bounds = array<i64: 16, 8, 32>}, {pipeline_mode = #tpu.pipeline_mode<synchronous>, transform_indices = @transform_2, window_bounds = array<i64: 32, 128>}, {pipeline_mode = #tpu.pipeline_mode<synchronous>, transform_indices = @transform_3, window_bounds = array<i64: 1, 128>}, {transform_indices = @transform_4, window_bounds = array<i64: 16, 128>}]} {
    %c0 = arith.constant 0 : index
    %c0_0 = arith.constant 0 : index
    %c0_1 = arith.constant 0 : index
    %0 = vector.load %arg1[%c0, %c0_0, %c0_1] : memref<16x8x8xbf16, #tpu.memory_space<vmem>>, vector<16x8x8xbf16>
    %c0_2 = arith.constant 0 : index
    %c0_3 = arith.constant 0 : index
    %c0_4 = arith.constant 0 : index
    %1 = vector.load %arg2[%c0_2, %c0_3, %c0_4] : memref<16x8x32xbf16, #tpu.memory_space<vmem>>, vector<16x8x32xbf16>
    "tpu.trace_start"() <{level = 10 : i32, message = "bij,bjh->bih"}> : () -> ()
    %cst = arith.constant dense<0.000000e+00> : vector<16x8x32xf32>
    %2 = tpu.matmul %0, %1, %cst {dimension_numbers = #tpu.dot_dimension_numbers<[2], [1], [1], [2], [0, 0, 0, 1, 1, 2], [0], [0]>} : vector<16x8x8xbf16>, vector<16x8x32xbf16>, vector<16x8x32xf32> -> vector<16x8x32xf32>
    "tpu.trace_stop"() : () -> ()
    %cst_5 = arith.constant 0.000000e+00 : f32
    %3 = vector.broadcast %cst_5 : f32 to vector<16x8x32xf32>
    %4 = arith.maximumf %2, %3 : vector<16x8x32xf32>
    %5 = vector.shape_cast %4 : vector<16x8x32xf32> to vector<128x32xf32>
    %6 = arith.truncf %5 : vector<128x32xf32> to vector<128x32xbf16>
    %c0_6 = arith.constant 0 : index
    %c0_7 = arith.constant 0 : index
    %7 = vector.load %arg3[%c0_6, %c0_7] : memref<32x128xbf16, #tpu.memory_space<vmem>>, vector<32x128xbf16>
    %cst_8 = arith.constant dense<0.000000e+00> : vector<128x128xf32>
    %8 = tpu.matmul %6, %7, %cst_8 {dimension_numbers = #tpu.dot_dimension_numbers<[1], [0], [0], [1], [0, 0, 1, 1], [], []>} : vector<128x32xbf16>, vector<32x128xbf16>, vector<128x128xf32> -> vector<128x128xf32>
    %c0_9 = arith.constant 0 : index
    %c0_10 = arith.constant 0 : index
    %9 = vector.load %arg4[%c0_9, %c0_10] : memref<1x128xf32, #tpu.memory_space<vmem>>, vector<1x128xf32>
    %10 = vector.broadcast %9 : vector<1x128xf32> to vector<128x128xf32>
    %11 = arith.addf %8, %10 : vector<128x128xf32>
    %12 = vector.shape_cast %11 : vector<128x128xf32> to vector<16x8x128xf32>
    %13 = arith.truncf %12 : vector<16x8x128xf32> to vector<16x8x128xbf16>
    "tpu.trace_start"() <{level = 10 : i32, message = "bij,bjh->bih"}> : () -> ()
    %cst_11 = arith.constant dense<0.000000e+00> : vector<16x8x128xf32>
    %14 = tpu.matmul %0, %13, %cst_11 {dimension_numbers = #tpu.dot_dimension_numbers<[2], [1], [1], [2], [0, 0, 0, 1, 1, 2], [0], [0]>} : vector<16x8x8xbf16>, vector<16x8x128xbf16>, vector<16x8x128xf32> -> vector<16x8x128xf32>
    "tpu.trace_stop"() : () -> ()
    %cst_12 = arith.constant 0.000000e+00 : f32
    %15 = vector.broadcast %cst_12 : f32 to vector<16x8x128xf32>
    %16 = arith.maximumf %14, %15 : vector<16x8x128xf32>
    %cst_13 = arith.constant 1.250000e-01 : f32
    %17 = vector.broadcast %cst_13 : f32 to vector<16x1x8xf32>
    "tpu.trace_start"() <{level = 10 : i32, message = "bon,bnh->boh"}> : () -> ()
    %cst_14 = arith.constant dense<0.000000e+00> : vector<16x1x128xf32>
    %18 = tpu.matmul %17, %16, %cst_14 {dimension_numbers = #tpu.dot_dimension_numbers<[2], [1], [1], [2], [0, 0, 0, 1, 1, 2], [0], [0]>} : vector<16x1x8xf32>, vector<16x8x128xf32>, vector<16x1x128xf32> -> vector<16x1x128xf32>
    "tpu.trace_stop"() : () -> ()
    %19 = vector.shape_cast %18 : vector<16x1x128xf32> to vector<16x128xf32>
    %c0_15 = arith.constant 0 : index
    %c0_16 = arith.constant 0 : index
    %20 = vector.load %arg5[%c0_15, %c0_16] : memref<16x128xf32, #tpu.memory_space<vmem>>, vector<16x128xf32>
    tpu.vector_store %arg5[%c0_15, %c0_16], %19 {strides = array<i32>} : memref<16x128xf32, #tpu.memory_space<vmem>>, vector<16x128xf32>,
    return
  }
  func.func @transform_0(%arg0: i32) -> (i32, i32, i32) {
    %c0_i32 = arith.constant 0 : i32
    %c0_i32_0 = arith.constant 0 : i32
    %c0_i32_1 = arith.constant 0 : i32
    return %arg0, %c0_i32, %c0_i32_0 : i32, i32, i32
  }
  func.func @transform_1(%arg0: i32) -> (i32, i32, i32) {
    %c0_i32 = arith.constant 0 : i32
    %c0_i32_0 = arith.constant 0 : i32
    %c0_i32_1 = arith.constant 0 : i32
    return %arg0, %c0_i32, %c0_i32_0 : i32, i32, i32
  }
  func.func @transform_2(%arg0: i32) -> (i32, i32) {
    %c0_i32 = arith.constant 0 : i32
    %c0_i32_0 = arith.constant 0 : i32
    %c0_i32_1 = arith.constant 0 : i32
    return %c0_i32, %c0_i32_0 : i32, i32
  }
  func.func @transform_3(%arg0: i32) -> (i32, i32) {
    %c0_i32 = arith.constant 0 : i32
    %c0_i32_0 = arith.constant 0 : i32
    %c0_i32_1 = arith.constant 0 : i32
    return %c0_i32, %c0_i32_0 : i32, i32
  }
  func.func @transform_4(%arg0: i32) -> (i32, i32) {
    %c0_i32 = arith.constant 0 : i32
    %c0_i32_0 = arith.constant 0 : i32
    return %arg0, %c0_i32 : i32, i32
  }
}

</mosaic_0001>

<bundles_post_ra>
// kernel: tpu_custom_call.1
= control target key start
LH: loop header
LB: loop body
LE: loop exit
PB: predicated region body
PF: predicated region fallthrough
CT: control target
= control target key end

     0   :  { %9 = vsyncpa [#allocation3], 0  ;;  %s4263_s0 = inlined_call_operand.vmem [shape: bf16[32,8,8], index: 0, kind: input, shape index: {}]   ;;  %s4264_s1 = inlined_call_operand.vmem [shape: bf16[32,8,32], index: 1, kind: input, shape index: {}]   ;;  %s4265_s2 = inlined_call_operand.vmem [shape: bf16[32,128], index: 2, kind: input, shape index: {}]   ;;  %s4266_s3 = inlined_call_operand.vmem [shape: f32[1,128], index: 3, kind: input, shape index: {}]   ;;  %s4267_s4 = inlined_call_operand.hbm [shape: f32[32,128], index: 4, kind: output, shape index: {}]  }
   0x1   :  { %11 = vsyncpa [#allocation3 + $0x1], 0  ;;  %s3760_s15 = smov 0   ;;  %s3762_s16 = smov 0  }
   0x2   :  { %s3764_s17 = smov 0   ;;  %s3766_s18 = smov 0  }
   0x3 LB: > { %s3781_s19 = sadd.s32 4294967295, %s3727_s18   ;;  %s3147_s20 = sadd.s32 4294967294, %s3727_s18   ;;  %s3727_s18 = sphi %s3766_s18, %s4273_s18   ;;  %s3723_s17 = sphi %s3764_s17, %s4272_s17   ;;  %s3719_s16 = sphi %s3762_s16, %s4271_s16   ;;  %s3715_s15 = sphi %s3760_s15, %s4270_s15  }
   0x4   : > { %s3785_s21 = sadd.s32 1, %s3727_s18   ;;  %s118_s22 = sadd.s32 1, %s3723_s17 }
   0x5   : > { %s115_s23 = ssub.s32 %s3727_s18, %s3785_s21  ;;  %p128_p0 = scmp.ne.s32.totalorder %s3723_s17, %s3719_s16 }
   0x6   : > { %p116_p1 = scmp.eq.s32.totalorder %s115_s23, 0  ;;  %p129_p2 = scmp.eq.s32.totalorder %s3781_s19, 1 }
   0x7   : > { %p134_p3 = scmp.ne.s32.totalorder %s3719_s16, %s3715_s15  ;;  %p135_p4 = scmp.eq.s32.totalorder %s3147_s20, 1 }
   0x8   : > { %s3796_s24 = scalar_select %p116_p1, %s3723_s17, %s118_s22  }
   0x9   : > { %p3798_p5 = por %p129_p2, %p128_p0  ;;  %p3802_p6 = por %p135_p4, %p134_p3 }
   0xa   : > { %p3150_p7 = scmp.ge.s32.totalorder %s3727_s18, 1  ;;  %p177_p8 = scmp.lt.s32.totalorder %s3727_s18, 3 }
   0xc   : > { %p178_p9 = pnand %p3150_p7, %p177_p8 }
   0xd   : > { %s3152_s27 = sshll.u32 (!%p178_p9), %s3781_s19, 4  ;;  %v3729_v0 = vmov (!%p178_p9), 0.0   ;;  %vm3730_vm0 = vmmov (!%p178_p9), 0   ;;  %vm258_vm1 = vcmask (!%p178_p9), 1043456   ;;  %vm254_vm2 = vcmask (!%p178_p9), 64512   ;;  %v3663_v49 = vld [vmem:[%s4265_s2] sm:$0xff] (!%p178_p9)  }
   0xe   : > { %181 = sbr.rel (%p178_p9) target bundleno = 991 (0x3df), region = 36  ;;  %3327 = vmatprep.subr.bf16.mxu0 (!%p178_p9), %v3729_v0  ;;  %3333 = vmatprep.subr.bf16.mxu1 (!%p178_p9), %v3729_v0  ;;  %p209_p10 = scmp.lt.s32.totalorder (!%p178_p9), %s3152_s27, 31  ;;  %v3664_v50 = vld [vmem:[%s4265_s2 + $0x8] sm:$0xff] (!%p178_p9)   ;;  %vm1039_vm3 = vcmask (!%p178_p9), 261120   ;;  %vm3021_vm4 = vcmask (!%p178_p9), 1041409   ;;  %vm3024_vm5 = vcmask (!%p178_p9), 1042434  }
   0xf   : > { %3329 = vmatprep.mubr.msk.bf16.mxu0 (!%p178_p9), %vm3730_vm0, %v3729_v0  ;;  %3335 = vmatprep.mubr.msk.bf16.mxu1 (!%p178_p9), %vm3730_vm0, %v3729_v0  ;;  %vm3027_vm6 = vcmask (!%p178_p9), 1043459   ;;  %vm3030_vm7 = vcmask (!%p178_p9), 1044484   ;;  %vm3033_vm8 = vcmask (!%p178_p9), 1045509   ;;  %vm3036_vm9 = vcmask (!%p178_p9), 1046534   ;;  %s205_s20 = sand.u32 (!%p178_p9), 1, %s3719_s16   ;;  %s3732_s7 = smov (!%p178_p9), [#allocation2]  }
  0x10   : > { %s3151_s22 = sshll.u32 (!%p178_p9), %s205_s20, 4  ;;  %vm3039_vm10 = vcmask (!%p178_p9), 1047559   ;;  %s4222_s6 = scalar_lea.sflag (!%p178_p9), [#allocation3], %s205_s20 }
  0x11   : > { %s4200_s23 = scalar_lea.vmem (!%p178_p9), [#allocation2], %s3151_s22 }
  0x15   : > { %s4275_s27 = smov (!%p209_p10, %s3152_s27), 31 }
  0x16   : > { %s3153_s28 = sshll.u32 %s4275_s27, 2  ;;  %s3073_s27 = sshll.u32 %s4200_s23, 4  ;;  %s4211_s27 = int_to_ptr.vmem [resolvable:$true] %s3073_s27 }
  0x17   : > { %s3818_s5 = scalar_lea.vmem %s4264_s1, %s3153_s28  ;;  %s3823_s8 = scalar_lea.vmem %s4263_s0, %s3153_s28 }
  0x18   : > { %v238_v1 = vld [vmem:[%s3818_s5] sm:$0xf]  ;;  %v239_v2 = vld [vmem:[%s3818_s5 + $0x4] sm:$0xf]  ;;  %v240_v5 = vld [vmem:[%s3818_s5 + $0x8] sm:$0xf] }
  0x19   : > { %v260_v3 = vsel %vm258_vm1, %v238_v1, 0  ;;  %v306_v4 = vsel %vm258_vm1, %v239_v2, 0  ;;  %v3831_v6 = vld [vmem:[%s3823_s8] sm:$0xf]  ;;  %v3834_v7 = vld [vmem:[%s3823_s8 + $0x4] sm:$0xf] }
  0x1a   : > { %3328 = vmatpush3.bf16.msra.mxu0 %v260_v3  ;;  %3334 = vmatpush3.bf16.msra.mxu1 %v306_v4  ;;  %v241_v8 = vld [vmem:[%s3818_s5 + $0xc] sm:$0xf]  ;;  %v352_v9 = vsel %vm258_vm1, %v240_v5, 0  ;;  %v242_v11 = vld [vmem:[%s3818_s5 + $0x10] sm:$0xf]  ;;  %s3220_s28 = sshll.u32 %s3781_s19, 8 }
  0x1b   : > { %3339 = vmatprep.subr.bf16.mxu0 %v3729_v0  ;;  %3345 = vmatprep.subr.bf16.mxu1 %v3729_v0  ;;  %v398_v10 = vsel %vm258_vm1, %v241_v8, 0  ;;  %v243_v12 = vld [vmem:[%s3818_s5 + $0x14] sm:$0xf]  ;;  %v3854_v13 = vld [vmem:[%s3823_s8 + $0x8] sm:$0xf]  ;;  %v444_v15 = vsel %vm258_vm1, %v242_v11, 0 }
  0x1c   : > { %v3857_v14 = vld [vmem:[%s3823_s8 + $0xc] sm:$0xf]  ;;  %v490_v16 = vsel %vm258_vm1, %v243_v12, 0  ;;  %v244_v17 = vld [vmem:[%s3818_s5 + $0x18] sm:$0xf]  ;;  %s3665_s19 = scalar_lea.vmem %s4211_s27, 256 }
  0x1d   : > { %3330 = vmatmul.mubr.msk.bf16.vlgmr.msra.gmra.mrb[0].mxu0 %vm254_vm2, %v3831_v6  ;;  %3336 = vmatmul.mubr.msk.bf16.vlgmr.msra.gmra.mrb[0].mxu1 %vm254_vm2, %v3834_v7  ;;  %v245_v18 = vld [vmem:[%s3818_s5 + $0x1c] sm:$0xf]  ;;  %v3874_v19 = vld [vmem:[%s3823_s8 + $0x10] sm:$0xf]  ;;  %v3877_v20 = vld [vmem:[%s3823_s8 + $0x14] sm:$0xf]  ;;  %p3666_p11 = scmp.ne.s32.totalorder %s4211_s27, %s3665_s19 }
  0x1e   : > { %3340 = vmatpush3.bf16.msra.mxu0 %v352_v9  ;;  %3346 = vmatpush3.bf16.msra.mxu1 %v398_v10  ;;  %v536_v21 = vsel %vm258_vm1, %v244_v17, 0  ;;  %v582_v22 = vsel %vm258_vm1, %v245_v18, 0  ;;  %v246_v23 = vld [vmem:[%s3818_s5 + $0x20] sm:$0xf]  ;;  %v247_v24 = vld [vmem:[%s3818_s5 + $0x24] sm:$0xf] }
  0x1f   : > { %3341 = vmatprep.mubr.msk.bf16.mxu0 %vm3730_vm0, %v3729_v0  ;;  %3347 = vmatprep.mubr.msk.bf16.mxu1 %vm3730_vm0, %v3729_v0  ;;  %v3894_v25 = vld [vmem:[%s3823_s8 + $0x18] sm:$0xf]  ;;  %v3897_v26 = vld [vmem:[%s3823_s8 + $0x1c] sm:$0xf]  ;;  %v628_v27 = vsel %vm258_vm1, %v246_v23, 0  ;;  %v674_v28 = vsel %vm258_vm1, %v247_v24, 0  ;;  %p3667_p12 = pnand %p3666_p11, %p3798_p5 }
  0x20   : > { %3351 = vmatprep.subr.bf16.mxu0 %v3729_v0  ;;  %3357 = vmatprep.subr.bf16.mxu1 %v3729_v0  ;;  %v248_v29 = vld [vmem:[%s3818_s5 + $0x28] sm:$0xf]  ;;  %v249_v30 = vld [vmem:[%s3818_s5 + $0x2c] sm:$0xf]  ;;  %v3914_v31 = vld [vmem:[%s3823_s8 + $0x20] sm:$0xf] }
  0x21   : > { %v3917_v32 = vld [vmem:[%s3823_s8 + $0x24] sm:$0xf]  ;;  %v720_v33 = vsel %vm258_vm1, %v248_v29, 0  ;;  %v766_v34 = vsel %vm258_vm1, %v249_v30, 0  ;;  %v250_v35 = vld [vmem:[%s3818_s5 + $0x30] sm:$0xf]  ;;  %p3668_p13 = pneg %p3667_p12 }
  0x22   : > { %v251_v36 = vld [vmem:[%s3818_s5 + $0x34] sm:$0xf]  ;;  %v3934_v37 = vld [vmem:[%s3823_s8 + $0x28] sm:$0xf]  ;;  %v3937_v38 = vld [vmem:[%s3823_s8 + $0x2c] sm:$0xf] }
  0x23   : > { %v812_v39 = vsel %vm258_vm1, %v250_v35, 0  ;;  %v858_v40 = vsel %vm258_vm1, %v251_v36, 0  ;;  %v252_v41 = vld [vmem:[%s3818_s5 + $0x38] sm:$0xf]  ;;  %v253_v42 = vld [vmem:[%s3818_s5 + $0x3c] sm:$0xf]  ;;  %s4216_s5 = scalar_lea.hbm %s4267_s4, %s3220_s28 }
  0x24   : > { %v3954_v43 = vld [vmem:[%s3823_s8 + $0x30] sm:$0xf]  ;;  %v3957_v44 = vld [vmem:[%s3823_s8 + $0x34] sm:$0xf]  ;;  %v904_v45 = vsel %vm258_vm1, %v252_v41, 0  ;;  %v950_v46 = vsel %vm258_vm1, %v253_v42, 0 }
  0x25   : > { %3342 = vmatmul.mubr.msk.bf16.vlgmr.msra.gmra.mrb[4].mxu0 %vm254_vm2, %v3854_v13  ;;  %3348 = vmatmul.mubr.msk.bf16.vlgmr.msra.gmra.mrb[4].mxu1 %vm254_vm2, %v3857_v14  ;;  %v3971_v47 = vld [vmem:[%s3823_s8 + $0x38] sm:$0xf]  ;;  %v3974_v48 = vld [vmem:[%s3823_s8 + $0x3c] sm:$0xf]  ;;  %s3669_s8 = sshll.u32 %s3732_s7, 4  ;;  %s3670_s8 = int_to_ptr.vmem [resolvable:$false] %s3669_s8 }
  0x26   : > { %3352 = vmatpush3.bf16.msra.mxu0 %v444_v15  ;;  %3358 = vmatpush3.bf16.msra.mxu1 %v490_v16  ;;  %s3671_s9 = scalar_lea.vmem %s3670_s8, 512  ;;  %p3672_p0 = scmp.lt.s32.totalorder %s4211_s27, %s3670_s8 }
  0x27   : > { %3353 = vmatprep.mubr.msk.bf16.mxu0 %vm3730_vm0, %v3729_v0  ;;  %3359 = vmatprep.mubr.msk.bf16.mxu1 %vm3730_vm0, %v3729_v0  ;;  %p3673_p1 = scmp.lt.s32.totalorder %s3671_s9, %s3665_s19 }
  0x28   : > { %3363 = vmatprep.subr.bf16.mxu0 %v3729_v0  ;;  %3369 = vmatprep.subr.bf16.mxu1 %v3729_v0 }
  0x29   : > { %p3674_p2 = por %p3673_p1, %p3672_p0 }
  0x2b   : > { %p3675_p3 = pnand %p3674_p2, %p3668_p13 }
  0x2d   : > { %3354 = vmatmul.mubr.msk.bf16.vlgmr.msra.gmra.mrb[8].mxu0 %vm254_vm2, %v3874_v19  ;;  %3360 = vmatmul.mubr.msk.bf16.vlgmr.msra.gmra.mrb[8].mxu1 %vm254_vm2, %v3877_v20 }
  0x2e   : > { %3364 = vmatpush3.bf16.msra.mxu0 %v536_v21  ;;  %3370 = vmatpush3.bf16.msra.mxu1 %v582_v22 }
  0x2f   : > { %3365 = vmatprep.mubr.msk.bf16.mxu0 %vm3730_vm0, %v3729_v0  ;;  %3371 = vmatprep.mubr.msk.bf16.mxu1 %vm3730_vm0, %v3729_v0 }
  0x30   : > { %3375 = vmatprep.subr.bf16.mxu0 %v3729_v0  ;;  %3381 = vmatprep.subr.bf16.mxu1 %v3729_v0 }
  0x35   : > { %3366 = vmatmul.mubr.msk.bf16.vlgmr.msra.gmra.mrb[12].mxu0 %vm254_vm2, %v3894_v25  ;;  %3372 = vmatmul.mubr.msk.bf16.vlgmr.msra.gmra.mrb[12].mxu1 %vm254_vm2, %v3897_v26 }
  0x36   : > { %3376 = vmatpush3.bf16.msra.mxu0 %v628_v27  ;;  %3382 = vmatpush3.bf16.msra.mxu1 %v674_v28 }
  0x37   : > { %3377 = vmatprep.mubr.msk.bf16.mxu0 %vm3730_vm0, %v3729_v0  ;;  %3383 = vmatprep.mubr.msk.bf16.mxu1 %vm3730_vm0, %v3729_v0 }
  0x38   : > { %3387 = vmatprep.subr.bf16.mxu0 %v3729_v0  ;;  %3393 = vmatprep.subr.bf16.mxu1 %v3729_v0 }
  0x3d   : > { %3378 = vmatmul.mubr.msk.bf16.vlgmr.msra.gmra.mrb[16].mxu0 %vm254_vm2, %v3914_v31  ;;  %3384 = vmatmul.mubr.msk.bf16.vlgmr.msra.gmra.mrb[16].mxu1 %vm254_vm2, %v3917_v32 }
  0x3e   : > { %3388 = vmatpush3.bf16.msra.mxu0 %v720_v33  ;;  %3394 = vmatpush3.bf16.msra.mxu1 %v766_v34 }
  0x3f   : > { %3389 = vmatprep.mubr.msk.bf16.mxu0 %vm3730_vm0, %v3729_v0  ;;  %3395 = vmatprep.mubr.msk.bf16.mxu1 %vm3730_vm0, %v3729_v0 }
  0x40   : > { %3399 = vmatprep.subr.bf16.mxu0 %v3729_v0  ;;  %3405 = vmatprep.subr.bf16.mxu1 %v3729_v0 }
  0x45   : > { %3390 = vmatmul.mubr.msk.bf16.vlgmr.msra.gmra.mrb[20].mxu0 %vm254_vm2, %v3934_v37  ;;  %3396 = vmatmul.mubr.msk.bf16.vlgmr.msra.gmra.mrb[20].mxu1 %vm254_vm2, %v3937_v38 }
  0x46   : > { %3400 = vmatpush3.bf16.msra.mxu0 %v812_v39  ;;  %3406 = vmatpush3.bf16.msra.mxu1 %v858_v40 }
  0x47   : > { %3401 = vmatprep.mubr.msk.bf16.mxu0 %vm3730_vm0, %v3729_v0  ;;  %3407 = vmatprep.mubr.msk.bf16.mxu1 %vm3730_vm0, %v3729_v0 }
  0x48   : > { %3411 = vmatprep.subr.bf16.mxu0 %v3729_v0  ;;  %3417 = vmatprep.subr.bf16.mxu1 %v3729_v0 }
  0x4d   : > { %3402 = vmatmul.mubr.msk.bf16.vlgmr.msra.gmra.mrb[24].mxu0 %vm254_vm2, %v3954_v43  ;;  %3408 = vmatmul.mubr.msk.bf16.vlgmr.msra.gmra.mrb[24].mxu1 %vm254_vm2, %v3957_v44 }
  0x4e   : > { %3412 = vmatpush3.bf16.msra.mxu0 %v904_v45  ;;  %3418 = vmatpush3.bf16.msra.mxu1 %v950_v46 }
  0x4f   : > { %3413 = vmatprep.mubr.msk.bf16.mxu0 %vm3730_vm0, %v3729_v0  ;;  %3419 = vmatprep.mubr.msk.bf16.mxu1 %vm3730_vm0, %v3729_v0 }
  0x50   : > { %3443 = vmatprep.subr.bf16.mxu1 %v3729_v0  ;;  %3423 = vmatprep.subr.bf16.mxu0 %v3663_v49 }
  0x55   : > { %3414 = vmatmul.mubr.msk.bf16.vlgmr.msra.gmra.mrb[28].mxu0 %vm254_vm2, %v3971_v47  ;;  %3420 = vmatmul.mubr.msk.bf16.vlgmr.msra.gmra.mrb[28].mxu1 %vm254_vm2, %v3974_v48 }
  0x56   : > { %3445 = vmatprep.mubr.msk.bf16.mxu1 %vm3730_vm0, %v3729_v0  ;;  %3424 = vmatpush3.bf16.msra.mxu0 %v3663_v49 }
  0x57   : > { %3425 = vmatprep.subr.bf16.mxu0 %v3664_v50 }
  0x5a   : > { %3426 = vmatpush3.bf16.msra.mxu0 %v3664_v50 }
  0x5b   : > { %3467 = vmatprep.subr.bf16.mxu0 %v3729_v0 }
  0xf0   : > { %v296_v51 = vpop.f32.mrb[0].mxu0  ;;  %v342_v52 = vpop.f32.mrb[0].mxu1 }
  0xf1   : > { %v992_v53 = vmax.f32 %v296_v51, 0.0  ;;  %v993_v54 = vmax.f32 %v342_v52, 0.0  ;;  %v3331_v55 = vpop.f32.mrb[1].mxu0  ;;  %v3337_v56 = vpop.f32.mrb[1].mxu1 }
  0xf2   : > { %v299_v57 = vpop.f32.mrb[2].mxu0  ;;  %v345_v58 = vpop.f32.mrb[2].mxu1 }
  0xf3   : > { %v1008_v59 = vpack.c.bf16 %v993_v54, %v992_v53  ;;  %v3332_v60 = vpop.f32.mrb[3].mxu0  ;;  %v3338_v61 = vpop.f32.mrb[3].mxu1 }
  0xf5   : > { %3427 = vmatprep.mubr.msk.bf16.mxu0 %vm1039_vm3, %v1008_v59 }
  0xf8   : > { %v388_v62 = vpop.f32.mrb[4].mxu0  ;;  %v434_v63 = vpop.f32.mrb[4].mxu1 }
  0xf9   : > { %v994_v1 = vmax.f32 %v388_v62, 0.0  ;;  %v995_v2 = vmax.f32 %v434_v63, 0.0  ;;  %v3343_v3 = vpop.f32.mrb[5].mxu0  ;;  %v3349_v4 = vpop.f32.mrb[5].mxu1 }
  0xfa   : > { %v391_v5 = vpop.f32.mrb[6].mxu0  ;;  %v437_v8 = vpop.f32.mrb[6].mxu1 }
  0xfb   : > { %v1009_v9 = vpack.c.bf16 %v995_v2, %v994_v1  ;;  %v3344_v10 = vpop.f32.mrb[7].mxu0  ;;  %v3350_v11 = vpop.f32.mrb[7].mxu1 }
  0xfd   : > { %3428 = vmatmul.mubr.msk.bf16.vlgmr.msra.gmra.mrb[32].mxu0 %vm1039_vm3, %v1009_v9 }
 0x100   : > { %v480_v12 = vpop.f32.mrb[8].mxu0  ;;  %v526_v15 = vpop.f32.mrb[8].mxu1 }
 0x101   : > { %v996_v16 = vmax.f32 %v480_v12, 0.0  ;;  %v997_v17 = vmax.f32 %v526_v15, 0.0  ;;  %v3355_v18 = vpop.f32.mrb[9].mxu0  ;;  %v3361_v21 = vpop.f32.mrb[9].mxu1 }
 0x102   : > { %v483_v22 = vpop.f32.mrb[10].mxu0  ;;  %v529_v23 = vpop.f32.mrb[10].mxu1 }
 0x103   : > { %v1010_v24 = vpack.c.bf16 %v997_v17, %v996_v16  ;;  %v3356_v27 = vpop.f32.mrb[11].mxu0  ;;  %v3362_v28 = vpop.f32.mrb[11].mxu1 }
 0x105   : > { %3431 = vmatprep.mubr.msk.bf16.mxu0 %vm1039_vm3, %v1010_v24 }
 0x108   : > { %v572_v29 = vpop.f32.mrb[12].mxu0  ;;  %v618_v30 = vpop.f32.mrb[12].mxu1 }
 0x109   : > { %v998_v33 = vmax.f32 %v572_v29, 0.0  ;;  %v999_v34 = vmax.f32 %v618_v30, 0.0  ;;  %v3367_v35 = vpop.f32.mrb[13].mxu0  ;;  %v3373_v36 = vpop.f32.mrb[13].mxu1 }
 0x10a   : > { %v575_v39 = vpop.f32.mrb[14].mxu0  ;;  %v621_v40 = vpop.f32.mrb[14].mxu1 }
 0x10b   : > { %v1011_v41 = vpack.c.bf16 %v999_v34, %v998_v33  ;;  %v3368_v42 = vpop.f32.mrb[15].mxu0  ;;  %v3374_v45 = vpop.f32.mrb[15].mxu1 }
 0x10d   : > { %3432 = vmatmul.mubr.msk.bf16.gmra.mrb[36].mxu0 %vm1039_vm3, %v1011_v41  ;;  %v4002_v41 = vld [vmem:[%s4266_s3] ss:$0 sm:$0xff] }
 0x110   : > { %v664_v46 = vpop.f32.mrb[16].mxu0  ;;  %v710_v49 = vpop.f32.mrb[16].mxu1 }
 0x111   : > { %v1000_v50 = vmax.f32 %v664_v46, 0.0  ;;  %v1001_v51 = vmax.f32 %v710_v49, 0.0  ;;  %v3379_v52 = vpop.f32.mrb[17].mxu0  ;;  %v3385_v53 = vpop.f32.mrb[17].mxu1 }
 0x112   : > { %v667_v54 = vpop.f32.mrb[18].mxu0  ;;  %v713_v55 = vpop.f32.mrb[18].mxu1 }
 0x113   : > { %v1012_v56 = vpack.c.bf16 %v1001_v51, %v1000_v50  ;;  %v3380_v57 = vpop.f32.mrb[19].mxu0  ;;  %v3386_v58 = vpop.f32.mrb[19].mxu1 }
 0x115   : > { %3435 = vmatprep.mubr.msk.bf16.mxu0 %vm1039_vm3, %v1012_v56 }
 0x118   : > { %v756_v59 = vpop.f32.mrb[20].mxu0  ;;  %v802_v60 = vpop.f32.mrb[20].mxu1 }
 0x119   : > { %v1002_v61 = vmax.f32 %v756_v59, 0.0  ;;  %v1003_v62 = vmax.f32 %v802_v60, 0.0  ;;  %v3391_v63 = vpop.f32.mrb[21].mxu0  ;;  %v3397_v1 = vpop.f32.mrb[21].mxu1 }
 0x11a   : > { %v759_v2 = vpop.f32.mrb[22].mxu0  ;;  %v805_v3 = vpop.f32.mrb[22].mxu1 }
 0x11b   : > { %v1013_v4 = vpack.c.bf16 %v1003_v62, %v1002_v61  ;;  %v3392_v5 = vpop.f32.mrb[23].mxu0  ;;  %v3398_v8 = vpop.f32.mrb[23].mxu1 }
 0x11d   : > { %3436 = vmatmul.mubr.msk.bf16.gmra.mrb[40].mxu0 %vm1039_vm3, %v1013_v4 }
 0x120   : > { %v848_v9 = vpop.f32.mrb[24].mxu0  ;;  %v894_v10 = vpop.f32.mrb[24].mxu1 }
 0x121   : > { %v1004_v11 = vmax.f32 %v848_v9, 0.0  ;;  %v1005_v12 = vmax.f32 %v894_v10, 0.0  ;;  %v3403_v15 = vpop.f32.mrb[25].mxu0  ;;  %v3409_v16 = vpop.f32.mrb[25].mxu1 }
 0x122   : > { %v851_v17 = vpop.f32.mrb[26].mxu0  ;;  %v897_v18 = vpop.f32.mrb[26].mxu1 }
 0x123   : > { %v1014_v21 = vpack.c.bf16 %v1005_v12, %v1004_v11  ;;  %v3404_v22 = vpop.f32.mrb[27].mxu0  ;;  %v3410_v23 = vpop.f32.mrb[27].mxu1 }
 0x125   : > { %3439 = vmatprep.mubr.msk.bf16.mxu0 %vm1039_vm3, %v1014_v21 }
 0x128   : > { %v940_v24 = vpop.f32.mrb[28].mxu0  ;;  %v986_v27 = vpop.f32.mrb[28].mxu1 }
 0x129   : > { %v1006_v28 = vmax.f32 %v940_v24, 0.0  ;;  %v1007_v29 = vmax.f32 %v986_v27, 0.0  ;;  %v3415_v30 = vpop.f32.mrb[29].mxu0  ;;  %v3421_v33 = vpop.f32.mrb[29].mxu1 }
 0x12a   : > { %v943_v34 = vpop.f32.mrb[30].mxu0  ;;  %v989_v35 = vpop.f32.mrb[30].mxu1 }
 0x12b   : > { %v1015_v36 = vpack.c.bf16 %v1007_v29, %v1006_v28  ;;  %v3416_v39 = vpop.f32.mrb[31].mxu0  ;;  %v3422_v40 = vpop.f32.mrb[31].mxu1 }
 0x12d   : > { %3440 = vmatmul.mubr.msk.bf16.gmra.mrb[44].mxu0 %vm1039_vm3, %v1015_v36 }
 0x12e   : > { %3469 = vmatprep.mubr.msk.bf16.mxu0 %vm3730_vm0, %v3729_v0 }
 0x1d0   : > { %v3429_v42 = vpop.f32.mrb[32].mxu0 }
 0x1d1   : > { %v1098_v45 = vpop.f32.mrb[33].mxu0  ;;  %v1107_v55 = vadd.f32 %v3429_v42, %v4002_v41 }
 0x1d2   : > { %v1099_v46 = vadd.f32 %v4002_v41, %v1098_v45  ;;  %v3430_v49 = vpop.f32.mrb[34].mxu0 }
 0x1d3   : > { %v1101_v50 = vpop.f32.mrb[35].mxu0  ;;  %v1163_v57 = vpack.c.bf16 %v1107_v55, %v1107_v55  ;;  %v1110_v62 = vadd.f32 %v3430_v49, %v4002_v41 }
 0x1d4   : > { %v1161_v51 = vpack.c.bf16 %v1099_v46, %v1099_v46  ;;  %v1102_v52 = vadd.f32 %v4002_v41, %v1101_v50 }
 0x1d5   : > { %v1264_v61 = vsel %vm258_vm1, %v1163_v57, 0  ;;  %v1164_v4 = vpack.c.bf16 %v1110_v62, %v1110_v62 }
 0x1d6   : > { %v1178_v53 = vsel %vm258_vm1, %v1161_v51, 0  ;;  %v1162_v54 = vpack.c.bf16 %v1102_v52, %v1102_v52 }
 0x1d7   : > { %3444 = vmatpush3.bf16.msra.mxu1 %v1178_v53 }
 0x1d8   : > { %3449 = vmatprep.subr.bf16.mxu1 %v3729_v0  ;;  %v1221_v56 = vsel %vm258_vm1, %v1162_v54, 0 }
 0x1da   : > { %3446 = vmatmul.mubr.msk.bf16.vlgmr.msra.gmra.mrb[32].mxu1 %vm254_vm2, %v3831_v6 }
 0x1db   : > { %3450 = vmatpush3.bf16.msra.mxu1 %v1221_v56  ;;  %3451 = vmatprep.mubr.msk.bf16.mxu1 %vm3730_vm0, %v3729_v0 }
 0x1dc   : > { %3455 = vmatprep.subr.bf16.mxu1 %v3729_v0 }
 0x1e0   : > { %v3433_v58 = vpop.f32.mrb[36].mxu0 }
 0x1e1   : > { %v1123_v59 = vadd.f32 %v3433_v58, %v4002_v41  ;;  %v1114_v60 = vpop.f32.mrb[37].mxu0 }
 0x1e2   : > { %v1115_v63 = vadd.f32 %v4002_v41, %v1114_v60  ;;  %v3434_v1 = vpop.f32.mrb[38].mxu0  ;;  %3452 = vmatmul.mubr.msk.bf16.vlgmr.msra.gmra.mrb[36].mxu1 %vm254_vm2, %v3834_v7  ;;  %v1307_v7 = vsel %vm258_vm1, %v1164_v4, 0 }
 0x1e3   : > { %3456 = vmatpush3.bf16.msra.mxu1 %v1264_v61  ;;  %v1117_v6 = vpop.f32.mrb[39].mxu0  ;;  %3457 = vmatprep.mubr.msk.bf16.mxu1 %vm3730_vm0, %v3729_v0  ;;  %v1167_v2 = vpack.c.bf16 %v1123_v59, %v1123_v59 }
 0x1e4   : > { %v1165_v3 = vpack.c.bf16 %v1115_v63, %v1115_v63  ;;  %3461 = vmatprep.subr.bf16.mxu1 %v3729_v0  ;;  %v1118_v9 = vadd.f32 %v4002_v41, %v1117_v6 }
 0x1e5   : > { %v1436_v8 = vsel %vm258_vm1, %v1167_v2, 0 }
 0x1e6   : > { %v1350_v5 = vsel %vm258_vm1, %v1165_v3, 0  ;;  %v1166_v10 = vpack.c.bf16 %v1118_v9, %v1118_v9 }
 0x1e7   : > { %3468 = vmatpush3.bf16.msra.mxu0 %v1350_v5 }
 0x1e8   : > { %3479 = vmatprep.subr.bf16.mxu0 %v3729_v0  ;;  %v1393_v11 = vsel %vm258_vm1, %v1166_v10, 0 }
 0x1ea   : > { %3458 = vmatmul.mubr.msk.bf16.vlgmr.msra.gmra.mrb[40].mxu1 %vm254_vm2, %v3854_v13  ;;  %3470 = vmatmul.mubr.msk.bf16.vlgmr.msra.gmra.mrb[48].mxu0 %vm254_vm2, %v3874_v19  ;;  %v1126_v19 = vadd.f32 %v3434_v1, %v4002_v41 }
 0x1eb   : > { %3462 = vmatpush3.bf16.msra.mxu1 %v1307_v7  ;;  %3480 = vmatpush3.bf16.msra.mxu0 %v1436_v8 }
 0x1ec   : > { %3463 = vmatprep.mubr.msk.bf16.mxu1 %vm3730_vm0, %v3729_v0  ;;  %3473 = vmatprep.subr.bf16.mxu1 %v3729_v0  ;;  %v1168_v23 = vpack.c.bf16 %v1126_v19, %v1126_v19 }
 0x1ed   : > { %3481 = vmatprep.mubr.msk.bf16.mxu0 %vm3730_vm0, %v3729_v0  ;;  %3491 = vmatprep.subr.bf16.mxu0 %v3729_v0 }
 0x1ee   : > { %v1479_v27 = vsel %vm258_vm1, %v1168_v23, 0 }
 0x1f0   : > { %v3437_v12 = vpop.f32.mrb[40].mxu0 }
 0x1f1   : > { %v1139_v13 = vadd.f32 %v3437_v12, %v4002_v41  ;;  %v1130_v15 = vpop.f32.mrb[41].mxu0 }
 0x1f2   : > { %3464 = vmatmul.mubr.msk.bf16.vlgmr.msra.gmra.mrb[44].mxu1 %vm254_vm2, %v3857_v14  ;;  %v1131_v16 = vadd.f32 %v4002_v41, %v1130_v15  ;;  %v3438_v17 = vpop.f32.mrb[42].mxu0  ;;  %3482 = vmatmul.mubr.msk.bf16.vlgmr.msra.gmra.mrb[52].mxu0 %vm254_vm2, %v3894_v25 }
 0x1f3   : > { %3474 = vmatpush3.bf16.msra.mxu1 %v1393_v11  ;;  %3475 = vmatprep.mubr.msk.bf16.mxu1 %vm3730_vm0, %v3729_v0  ;;  %v1133_v18 = vpop.f32.mrb[43].mxu0  ;;  %v1171_v22 = vpack.c.bf16 %v1139_v13, %v1139_v13 }
 0x1f4   : > { %3485 = vmatprep.subr.bf16.mxu1 %v3729_v0  ;;  %v1169_v21 = vpack.c.bf16 %v1131_v16, %v1131_v16  ;;  %3493 = vmatprep.mubr.msk.bf16.mxu0 %vm3730_vm0, %v3729_v0  ;;  %v1134_v24 = vadd.f32 %v4002_v41, %v1133_v18 }
 0x1f5   : > { %v1608_v25 = vsel %vm258_vm1, %v1171_v22, 0 }
 0x1f6   : > { %v1522_v14 = vsel %vm258_vm1, %v1169_v21, 0  ;;  %v1170_v28 = vpack.c.bf16 %v1134_v24, %v1134_v24 }
 0x1f7   : > { %3492 = vmatpush3.bf16.msra.mxu0 %v1522_v14 }
 0x1f8   : > { %3503 = vmatprep.subr.bf16.mxu0 %v3729_v0  ;;  %v1565_v29 = vsel %vm258_vm1, %v1170_v28, 0 }
 0x1fa   : > { %3476 = vmatmul.mubr.msk.bf16.vlgmr.msra.gmra.mrb[48].mxu1 %vm254_vm2, %v3877_v20  ;;  %3494 = vmatmul.mubr.msk.bf16.vlgmr.msra.gmra.mrb[56].mxu0 %vm254_vm2, %v3914_v31  ;;  %v1142_v31 = vadd.f32 %v3438_v17, %v4002_v41 }
 0x1fb   : > { %3486 = vmatpush3.bf16.msra.mxu1 %v1479_v27  ;;  %3487 = vmatprep.mubr.msk.bf16.mxu1 %vm3730_vm0, %v3729_v0 }
 0x1fc   : > { %3497 = vmatprep.subr.bf16.mxu1 %v3729_v0  ;;  %3504 = vmatpush3.bf16.msra.mxu0 %v1608_v25  ;;  %v1172_v42 = vpack.c.bf16 %v1142_v31, %v1142_v31 }
 0x1fd   : > { %3505 = vmatprep.mubr.msk.bf16.mxu0 %vm3730_vm0, %v3729_v0  ;;  %3515 = vmatprep.subr.bf16.mxu0 %v3729_v0 }
 0x1fe   : > { %v1651_v49 = vsel %vm258_vm1, %v1172_v42, 0 }
 0x200   : > { %v3441_v30 = vpop.f32.mrb[44].mxu0 }
 0x201   : > { %v1155_v20 = vadd.f32 %v3441_v30, %v4002_v41  ;;  %v1146_v33 = vpop.f32.mrb[45].mxu0 }
 0x202   : > { %3488 = vmatmul.mubr.msk.bf16.vlgmr.msra.gmra.mrb[52].mxu1 %vm254_vm2, %v3897_v26  ;;  %v1147_v34 = vadd.f32 %v4002_v41, %v1146_v33  ;;  %v3442_v35 = vpop.f32.mrb[46].mxu0  ;;  %3506 = vmatmul.mubr.msk.bf16.vlgmr.msra.gmra.mrb[60].mxu0 %vm254_vm2, %v3934_v37 }
 0x203   : > { %3498 = vmatpush3.bf16.msra.mxu1 %v1565_v29  ;;  %3499 = vmatprep.mubr.msk.bf16.mxu1 %vm3730_vm0, %v3729_v0  ;;  %v1158_v36 = vadd.f32 %v3442_v35, %v4002_v41  ;;  %v1149_v39 = vpop.f32.mrb[47].mxu0  ;;  %v1175_v26 = vpack.c.bf16 %v1155_v20, %v1155_v20 }
 0x204   : > { %3509 = vmatprep.subr.bf16.mxu1 %v3729_v0  ;;  %v1173_v40 = vpack.c.bf16 %v1147_v34, %v1147_v34  ;;  %3517 = vmatprep.mubr.msk.bf16.mxu0 %vm3730_vm0, %v3729_v0  ;;  %v1150_v37 = vadd.f32 %v4002_v41, %v1149_v39 }
 0x205   : > { %v1780_v46 = vsel %vm258_vm1, %v1175_v26, 0 }
 0x206   : > { %v1694_v45 = vsel %vm258_vm1, %v1173_v40, 0  ;;  %v1174_v50 = vpack.c.bf16 %v1150_v37, %v1150_v37 }
 0x207   : > { %3516 = vmatpush3.bf16.msra.mxu0 %v1694_v45 }
 0x208   : > { %3527 = vmatprep.subr.bf16.mxu0 %v3729_v0  ;;  %v1737_v41 = vsel %vm258_vm1, %v1174_v50, 0 }
 0x20a   : > { %3500 = vmatmul.mubr.msk.bf16.vlgmr.msra.gmra.mrb[56].mxu1 %vm254_vm2, %v3917_v32  ;;  %3518 = vmatmul.mubr.msk.bf16.vlgmr.msra.gmra.mrb[64].mxu0 %vm254_vm2, %v3954_v43  ;;  %v1176_v32 = vpack.c.bf16 %v1158_v36, %v1158_v36 }
 0x20b   : > { %3510 = vmatpush3.bf16.msra.mxu1 %v1651_v49  ;;  %3511 = vmatprep.mubr.msk.bf16.mxu1 %vm3730_vm0, %v3729_v0 }
 0x20c   : > { %3521 = vmatprep.subr.bf16.mxu1 %v3729_v0  ;;  %3528 = vmatpush3.bf16.msra.mxu0 %v1780_v46  ;;  %v1823_v43 = vsel %vm258_vm1, %v1176_v32, 0 }
 0x20d   : > { %3529 = vmatprep.mubr.msk.bf16.mxu0 %vm3730_vm0, %v3729_v0  ;;  %3539 = vmatprep.subr.mxu0 %v3729_v0 }
 0x212   : > { %3512 = vmatmul.mubr.msk.bf16.vlgmr.msra.gmra.mrb[60].mxu1 %vm254_vm2, %v3937_v38  ;;  %3530 = vmatmul.mubr.msk.bf16.vlgmr.msra.gmra.mrb[68].mxu0 %vm254_vm2, %v3971_v47 }
 0x213   : > { %3522 = vmatpush3.bf16.msra.mxu1 %v1737_v41  ;;  %3523 = vmatprep.mubr.msk.bf16.mxu1 %vm3730_vm0, %v3729_v0 }
 0x214   : > { %3533 = vmatprep.subr.bf16.mxu1 %v3729_v0  ;;  %3541 = vmatprep.mubr.msk.f32.mxu0 %vm3730_vm0, %v3729_v0 }
 0x21a   : > { %3524 = vmatmul.mubr.msk.bf16.vlgmr.msra.gmra.mrb[64].mxu1 %vm254_vm2, %v3957_v44  ;;  %v3731_v44 = vmov 0.125  }
 0x21b   : > { %3534 = vmatpush3.bf16.msra.mxu1 %v1823_v43  ;;  %3535 = vmatprep.mubr.msk.bf16.mxu1 %vm3730_vm0, %v3729_v0 }
 0x21c   : > { %3544 = vmatprep.subr.mxu1 %v3729_v0 }
 0x222   : > { %3536 = vmatmul.mubr.msk.bf16.vlgmr.msra.gmra.mrb[68].mxu1 %vm254_vm2, %v3974_v48 }
 0x223   : > { %3546 = vmatprep.mubr.msk.f32.mxu1 %vm3730_vm0, %v3729_v0 }
 0x2ad   : > { %v1214_v38 = vpop.f32.mrb[32].mxu1 }
 0x2ae   : > { %v1865_v47 = vmax.f32 %v1214_v38, 0.0  ;;  %v3447_v51 = vpop.f32.mrb[33].mxu1 }
 0x2af   : > { %v1217_v52 = vpop.f32.mrb[34].mxu1 }
 0x2b0   : > { %v3448_v53 = vpop.f32.mrb[35].mxu1  ;;  %3540 = vmatpush3.msra.mxu0 %v1865_v47 }
 0x2b1   : > { %3549 = vmatprep.subr.mxu0 %v3729_v0  ;;  %3542 = vmatmul.mubr.msk.f32.vlgmr.msra.gmra.mrb[72].mxu0 %vm254_vm2, %v3731_v44 }
 0x2b2   : > { %3551 = vmatprep.mubr.msk.f32.mxu0 %vm3730_vm0, %v3729_v0 }
 0x2b5   : > { %v1257_v54 = vpop.f32.mrb[36].mxu1 }
 0x2b6   : > { %v1866_v48 = vmax.f32 %v1257_v54, 0.0  ;;  %v3453_v55 = vpop.f32.mrb[37].mxu1 }
 0x2b7   : > { %v1260_v56 = vpop.f32.mrb[38].mxu1 }
 0x2b8   : > { %v3454_v57 = vpop.f32.mrb[39].mxu1  ;;  %3545 = vmatpush3.msra.mxu1 %v1866_v48 }
 0x2b9   : > { %3554 = vmatprep.subr.mxu1 %v3729_v0  ;;  %3547 = vmatmul.mubr.msk.f32.vlgmr.msra.gmra.mrb[72].mxu1 %vm254_vm2, %v3731_v44 }
 0x2ba   : > { %3556 = vmatprep.mubr.msk.f32.mxu1 %vm3730_vm0, %v3729_v0 }
 0x2bd   : > { %v1300_v58 = vpop.f32.mrb[40].mxu1  ;;  %v1386_v59 = vpop.f32.mrb[48].mxu0 }
 0x2be   : > { %v1867_v60 = vmax.f32 %v1300_v58, 0.0  ;;  %v3459_v61 = vpop.f32.mrb[41].mxu1  ;;  %v1869_v62 = vmax.f32 %v1386_v59, 0.0  ;;  %v3471_v63 = vpop.f32.mrb[49].mxu0 }
 0x2bf   : > { %v1303_v1 = vpop.f32.mrb[42].mxu1  ;;  %v1389_v6 = vpop.f32.mrb[50].mxu0 }
 0x2c0   : > { %v3460_v2 = vpop.f32.mrb[43].mxu1  ;;  %3550 = vmatpush3.msra.mxu0 %v1867_v60  ;;  %v3472_v3 = vpop.f32.mrb[51].mxu0 }
 0x2c1   : > { %3559 = vmatprep.subr.mxu0 %v3729_v0  ;;  %3552 = vmatmul.mubr.msk.f32.vlgmr.msra.gmra.mrb[74].mxu0 %vm254_vm2, %v3731_v44 }
 0x2c2   : > { %3560 = vmatpush3.msra.mxu0 %v1869_v62  ;;  %3561 = vmatprep.mubr.msk.f32.mxu0 %vm3730_vm0, %v3729_v0 }
 0x2c3   : > { %3569 = vmatprep.subr.mxu0 %v3729_v0 }
 0x2c5   : > { %v1343_v4 = vpop.f32.mrb[44].mxu1  ;;  %v1472_v5 = vpop.f32.mrb[52].mxu0  ;;  %3562 = vmatmul.mubr.msk.f32.vlgmr.msra.gmra.mrb[76].mxu0 %vm254_vm2, %v3731_v44 }
 0x2c6   : > { %v1868_v8 = vmax.f32 %v1343_v4, 0.0  ;;  %v3465_v9 = vpop.f32.mrb[45].mxu1  ;;  %v1871_v7 = vmax.f32 %v1472_v5, 0.0  ;;  %v3483_v10 = vpop.f32.mrb[53].mxu0  ;;  %3571 = vmatprep.mubr.msk.f32.mxu0 %vm3730_vm0, %v3729_v0 }
 0x2c7   : > { %v1346_v11 = vpop.f32.mrb[46].mxu1  ;;  %v1475_v12 = vpop.f32.mrb[54].mxu0 }
 0x2c8   : > { %v3466_v13 = vpop.f32.mrb[47].mxu1  ;;  %3555 = vmatpush3.msra.mxu1 %v1868_v8  ;;  %v3484_v15 = vpop.f32.mrb[55].mxu0  ;;  %3570 = vmatpush3.msra.mxu0 %v1871_v7 }
 0x2c9   : > { %3564 = vmatprep.subr.mxu1 %v3729_v0  ;;  %3557 = vmatmul.mubr.msk.f32.vlgmr.msra.gmra.mrb[74].mxu1 %vm254_vm2, %v3731_v44 }
 0x2ca   : > { %3566 = vmatprep.mubr.msk.f32.mxu1 %vm3730_vm0, %v3729_v0  ;;  %3579 = vmatprep.subr.mxu0 %v3729_v0 }
 0x2cb   : > { %3572 = vmatmul.mubr.msk.f32.vlgmr.msra.gmra.mrb[78].mxu0 %vm254_vm2, %v3731_v44 }
 0x2cc   : > { %3581 = vmatprep.mubr.msk.f32.mxu0 %vm3730_vm0, %v3729_v0 }
 0x2cd   : > { %v1429_v19 = vpop.f32.mrb[48].mxu1  ;;  %v1558_v16 = vpop.f32.mrb[56].mxu0 }
 0x2ce   : > { %v1870_v17 = vmax.f32 %v1429_v19, 0.0  ;;  %v3477_v18 = vpop.f32.mrb[49].mxu1  ;;  %v1873_v21 = vmax.f32 %v1558_v16, 0.0  ;;  %v3495_v22 = vpop.f32.mrb[57].mxu0 }
 0x2cf   : > { %v1432_v23 = vpop.f32.mrb[50].mxu1  ;;  %v1561_v14 = vpop.f32.mrb[58].mxu0 }
 0x2d0   : > { %v3478_v24 = vpop.f32.mrb[51].mxu1  ;;  %3565 = vmatpush3.msra.mxu1 %v1870_v17  ;;  %v3496_v25 = vpop.f32.mrb[59].mxu0  ;;  %3580 = vmatpush3.msra.mxu0 %v1873_v21 }
 0x2d1   : > { %3574 = vmatprep.subr.mxu1 %v3729_v0  ;;  %3567 = vmatmul.mubr.msk.f32.vlgmr.msra.gmra.mrb[76].mxu1 %vm254_vm2, %v3731_v44 }
 0x2d2   : > { %3576 = vmatprep.mubr.msk.f32.mxu1 %vm3730_vm0, %v3729_v0  ;;  %3582 = vmatmul.mubr.msk.f32.vlgmr.msra.gmra.mrb[80].mxu0 %vm254_vm2, %v3731_v44 }
 0x2d3   : > { %3589 = vmatprep.subr.mxu0 %v3729_v0  ;;  %3591 = vmatprep.mubr.msk.f32.mxu0 %vm3730_vm0, %v3729_v0 }
 0x2d5   : > { %v1515_v27 = vpop.f32.mrb[52].mxu1  ;;  %v1644_v28 = vpop.f32.mrb[60].mxu0 }
 0x2d6   : > { %v1872_v29 = vmax.f32 %v1515_v27, 0.0  ;;  %v3489_v30 = vpop.f32.mrb[53].mxu1  ;;  %v1875_v20 = vmax.f32 %v1644_v28, 0.0  ;;  %v3507_v33 = vpop.f32.mrb[61].mxu0 }
 0x2d7   : > { %v1518_v31 = vpop.f32.mrb[54].mxu1  ;;  %v1647_v34 = vpop.f32.mrb[62].mxu0 }
 0x2d8   : > { %v3490_v35 = vpop.f32.mrb[55].mxu1  ;;  %3575 = vmatpush3.msra.mxu1 %v1872_v29  ;;  %v3508_v36 = vpop.f32.mrb[63].mxu0  ;;  %3590 = vmatpush3.msra.mxu0 %v1875_v20 }
 0x2d9   : > { %3584 = vmatprep.subr.mxu1 %v3729_v0  ;;  %3577 = vmatmul.mubr.msk.f32.vlgmr.msra.gmra.mrb[78].mxu1 %vm254_vm2, %v3731_v44 }
 0x2da   : > { %3586 = vmatprep.mubr.msk.f32.mxu1 %vm3730_vm0, %v3729_v0  ;;  %3592 = vmatmul.mubr.msk.f32.vlgmr.msra.gmra.mrb[82].mxu0 %vm254_vm2, %v3731_v44 }
 0x2db   : > { %3599 = vmatprep.subr.mxu0 %v3729_v0  ;;  %3601 = vmatprep.mubr.msk.f32.mxu0 %vm3730_vm0, %v3729_v0 }
 0x2dd   : > { %v1601_v39 = vpop.f32.mrb[56].mxu1  ;;  %v1730_v40 = vpop.f32.mrb[64].mxu0 }
 0x2de   : > { %v1874_v26 = vmax.f32 %v1601_v39, 0.0  ;;  %v3501_v42 = vpop.f32.mrb[57].mxu1  ;;  %v1877_v45 = vmax.f32 %v1730_v40, 0.0  ;;  %v3519_v37 = vpop.f32.mrb[65].mxu0 }
 0x2df   : > { %v1604_v46 = vpop.f32.mrb[58].mxu1  ;;  %v1733_v49 = vpop.f32.mrb[66].mxu0 }
 0x2e0   : > { %v3502_v50 = vpop.f32.mrb[59].mxu1  ;;  %3585 = vmatpush3.msra.mxu1 %v1874_v26  ;;  %v3520_v41 = vpop.f32.mrb[67].mxu0  ;;  %3600 = vmatpush3.msra.mxu0 %v1877_v45 }
 0x2e1   : > { %3587 = vmatmul.mubr.msk.f32.vlgmr.msra.gmra.mrb[80].mxu1 %vm254_vm2, %v3731_v44  ;;  %3594 = vmatprep.subr.mxu1 %v3729_v0 }
 0x2e2   : > { %3596 = vmatprep.mubr.msk.f32.mxu1 %vm3730_vm0, %v3729_v0  ;;  %3602 = vmatmul.mubr.msk.f32.vlgmr.msra.gmra.mrb[84].mxu0 %vm254_vm2, %v3731_v44 }
 0x2e3   : > { %3609 = vmatprep.subr.mxu0 %v3729_v0  ;;  %3611 = vmatprep.mubr.msk.f32.mxu0 %vm3730_vm0, %v3729_v0 }
 0x2e5   : > { %v1687_v32 = vpop.f32.mrb[60].mxu1  ;;  %v1816_v43 = vpop.f32.mrb[68].mxu0 }
 0x2e6   : > { %v1876_v38 = vmax.f32 %v1687_v32, 0.0  ;;  %v3513_v47 = vpop.f32.mrb[61].mxu1  ;;  %v1879_v51 = vmax.f32 %v1816_v43, 0.0  ;;  %v3531_v52 = vpop.f32.mrb[69].mxu0 }
 0x2e7   : > { %v1690_v53 = vpop.f32.mrb[62].mxu1  ;;  %v1819_v54 = vpop.f32.mrb[70].mxu0 }
 0x2e8   : > { %v3514_v48 = vpop.f32.mrb[63].mxu1  ;;  %3595 = vmatpush3.msra.mxu1 %v1876_v38  ;;  %3610 = vmatpush3.msra.mxu0 %v1879_v51  ;;  %v3532_v55 = vpop.f32.mrb[71].mxu0 }
 0x2e9   : > { %3597 = vmatmul.mubr.msk.f32.vlgmr.msra.gmra.mrb[82].mxu1 %vm254_vm2, %v3731_v44  ;;  %3604 = vmatprep.subr.mxu1 %v3729_v0 }
 0x2ea   : > { %3606 = vmatprep.mubr.msk.f32.mxu1 %vm3730_vm0, %v3729_v0  ;;  %3612 = vmatmul.mubr.msk.f32.vlgmr.msra.gmra.mrb[86].mxu0 %vm254_vm2, %v3731_v44 }
 0x2ed   : > { %v1773_v56 = vpop.f32.mrb[64].mxu1 }
 0x2ee   : > { %v1878_v57 = vmax.f32 %v1773_v56, 0.0  ;;  %v3525_v58 = vpop.f32.mrb[65].mxu1 }
 0x2ef   : > { %v1776_v59 = vpop.f32.mrb[66].mxu1 }
 0x2f0   : > { %v3526_v60 = vpop.f32.mrb[67].mxu1  ;;  %3605 = vmatpush3.msra.mxu1 %v1878_v57 }
 0x2f1   : > { %3607 = vmatmul.mubr.msk.f32.vlgmr.msra.gmra.mrb[84].mxu1 %vm254_vm2, %v3731_v44  ;;  %3614 = vmatprep.subr.mxu1 %v3729_v0 }
 0x2f2   : > { %3616 = vmatprep.mubr.msk.f32.mxu1 %vm3730_vm0, %v3729_v0 }
 0x2f5   : > { %v1859_v61 = vpop.f32.mrb[68].mxu1 }
 0x2f6   : > { %v1880_v62 = vmax.f32 %v1859_v61, 0.0  ;;  %v3537_v63 = vpop.f32.mrb[69].mxu1 }
 0x2f7   : > { %v1862_v1 = vpop.f32.mrb[70].mxu1 }
 0x2f8   : > { %3615 = vmatpush3.msra.mxu1 %v1880_v62  ;;  %v3538_v6 = vpop.f32.mrb[71].mxu1 }
 0x2f9   : > { %3617 = vmatmul.mubr.msk.f32.vlgmr.msra.gmra.mrb[86].mxu1 %vm254_vm2, %v3731_v44 }
 0x384   : > { %v1950_v2 = vpop.f32.mrb[72].mxu0 }
 0x385   : > { %v3543_v3 = vpop.f32.mrb[73].mxu0 }
 0x38c   : > { %v2020_v4 = vpop.f32.mrb[72].mxu1 }
 0x38d   : > { %v3020_v5 = vrot.slane %v2020_v4, 7  ;;  %v3548_v8 = vpop.f32.mrb[73].mxu1 }
 0x38f   : > { %v3022_v9 = vsel %vm3021_vm4, %v3020_v5, %v1950_v2 }
 0x394   : > { %v2090_v7 = vpop.f32.mrb[74].mxu0 }
 0x395   : > { %v3023_v0 = vrot.slane %v2090_v7, 6  ;;  %v3553_v10 = vpop.f32.mrb[75].mxu0 }
 0x397   : > { %v3025_v11 = vsel %vm3024_vm5, %v3023_v0, %v3022_v9 }
 0x398   : > { %v2230_v12 = vpop.f32.mrb[76].mxu0 }
 0x399   : > { %v3563_v13 = vpop.f32.mrb[77].mxu0  ;;  %v3029_v19 = vrot.slane %v2230_v12, 4 }
 0x39c   : > { %v2160_v15 = vpop.f32.mrb[74].mxu1 }
 0x39d   : > { %v3026_v44 = vrot.slane %v2160_v15, 5  ;;  %v3558_v16 = vpop.f32.mrb[75].mxu1 }
 0x39e   : > { %v2370_v17 = vpop.f32.mrb[78].mxu0 }
 0x39f   : > { %v3028_v18 = vsel %vm3027_vm6, %v3026_v44, %v3025_v11  ;;  %v3573_v21 = vpop.f32.mrb[79].mxu0  ;;  %v3035_v14 = vrot.slane %v2370_v17, 2 }
 0x3a0   : > { %v3031_v22 = vsel %vm3030_vm7, %v3029_v19, %v3028_v18 }
 0x3a4   : > { %v2300_v23 = vpop.f32.mrb[76].mxu1 }
 0x3a5   : > { %v3032_v24 = vrot.slane %v2300_v23, 3  ;;  %v3568_v25 = vpop.f32.mrb[77].mxu1  ;;  %v2510_v27 = vpop.f32.mrb[80].mxu0 }
 0x3a6   : > { %v3583_v28 = vpop.f32.mrb[81].mxu0 }
 0x3a7   : > { %v3034_v29 = vsel %vm3033_vm8, %v3032_v24, %v3031_v22 }
 0x3a8   : > { %v3037_v30 = vsel %vm3036_vm9, %v3035_v14, %v3034_v29 }
 0x3ac   : > { %v2440_v20 = vpop.f32.mrb[78].mxu1 }
 0x3ad   : > { %v3038_v33 = vrot.slane %v2440_v20, 1  ;;  %v3578_v31 = vpop.f32.mrb[79].mxu1  ;;  %v2650_v34 = vpop.f32.mrb[82].mxu0 }
 0x3ae   : > { %v3593_v35 = vpop.f32.mrb[83].mxu0  ;;  %v3043_v40 = vrot.slane %v2650_v34, 6 }
 0x3af   : > { %v3040_v36 = vsel %vm3039_vm10, %v3038_v33, %v3037_v30 }
 0x3b0   : > { %3057 = vst [vmem:[%s4200_s23] sm:$0xff] %v3040_v36 }
 0x3b4   : > { %v2580_v39 = vpop.f32.mrb[80].mxu1 }
 0x3b5   : > { %v3041_v26 = vrot.slane %v2580_v39, 7  ;;  %v3588_v42 = vpop.f32.mrb[81].mxu1  ;;  %v2790_v45 = vpop.f32.mrb[84].mxu0 }
 0x3b6   : > { %v3603_v37 = vpop.f32.mrb[85].mxu0  ;;  %v3047_v41 = vrot.slane %v2790_v45, 4 }
 0x3b7   : > { %v3042_v46 = vsel %vm3021_vm4, %v3041_v26, %v2510_v27 }
 0x3b8   : > { %v3044_v49 = vsel %vm3024_vm5, %v3043_v40, %v3042_v46 }
 0x3bc   : > { %v2720_v50 = vpop.f32.mrb[82].mxu1 }
 0x3bd   : > { %v3045_v32 = vrot.slane %v2720_v50, 5  ;;  %v3598_v43 = vpop.f32.mrb[83].mxu1  ;;  %v2930_v38 = vpop.f32.mrb[86].mxu0 }
 0x3be   : > { %v3613_v47 = vpop.f32.mrb[87].mxu0  ;;  %v3051_v54 = vrot.slane %v2930_v38, 2 }
 0x3bf   : > { %v3046_v51 = vsel %vm3027_vm6, %v3045_v32, %v3044_v49 }
 0x3c0   : > { %v3048_v52 = vsel %vm3030_vm7, %v3047_v41, %v3046_v51 }
 0x3c4   : > { %v2860_v53 = vpop.f32.mrb[84].mxu1 }
 0x3c5   : > { %v3049_v48 = vrot.slane %v2860_v53, 3  ;;  %v3608_v55 = vpop.f32.mrb[85].mxu1 }
 0x3c7   : > { %v3050_v56 = vsel %vm3033_vm8, %v3049_v48, %v3048_v52 }
 0x3c8   : > { %v3052_v57 = vsel %vm3036_vm9, %v3051_v54, %v3050_v56 }
 0x3cc   : > { %v3000_v58 = vpop.f32.mrb[86].mxu1 }
 0x3cd   : > { %v3053_v59 = vrot.slane %v3000_v58, 1  ;;  %v3618_v60 = vpop.f32.mrb[87].mxu1 }
 0x3cf   : > { %v3054_v61 = vsel %vm3039_vm10, %v3053_v59, %v3052_v57 }
 0x3d0   : > { %3058 = vst [vmem:[%s4200_s23 + $0x8] sm:$0xff] %v3054_v61 }
 0x3d1   : > { %3678 = shalt.err (!%p3675_p3)
}
 0x3d2   : > { %s3679_s10 = scalar_lea.hbm %s4216_s5, 256  ;;  %s3683_s13 = scalar_lea.hbm %s4267_s4, 512 }
 0x3d3   : > { %p3680_p4 = scmp.ne.s32.totalorder %s4216_s5, %s3679_s10  ;;  %p3684_p9 = scmp.lt.u32.totalorder %s4216_s5, %s4267_s4 }
 0x3d4   : > { %p3685_p10 = scmp.lt.u32.totalorder %s3683_s13, %s3679_s10  ;;  %p3687_p12 = scmp.lt.u32.totalorder %s3679_s10, %s4216_s5 }
 0x3d5   : > { %p3681_p7 = pnand %p3680_p4, %p3798_p5 }
 0x3d6   : > { %p3686_p11 = por %p3685_p10, %p3684_p9 }
 0x3d7   : > { %p3682_p8 = pneg %p3681_p7 }
 0x3d8   : > { %p3688_p13 = por %p3687_p12, %p3686_p11 }
 0x3da   : > { %p3689_p0 = pnand %p3688_p13, %p3682_p8 }
 0x3dc   : > { %3692 = shalt.err (!%p3689_p0)
}
 0x3dd   : > { %s3733_s22 = smov 128   ;;  %s3734_s23 = smov 8  }
 0x3de   : > { %3619 = dma.vmem_to_hbm [thread:$0]  (%p3798_p5), %s4211_s27, 256, %s4216_s5, %s4222_s6, %s3733_s22, %s3733_s22, %s3734_s23  }
 0x3df PF: > { %p3625_p1 = scmp.ge.s32.totalorder %s3727_s18, 2  ;;  %s3088_s28 = sand.u32 1, %s3715_s15  }
 0x3e0   : > { %s3089_s29 = scalar_lea.sflag [#allocation3], %s3088_s28 }
 0x3e1   : > { %p3622_p2 = pnand %p3625_p1, %p3802_p6 }
 0x3e3   : > { %3710 = dma.done.wait (!%p3622_p2), %s3089_s29, 256  }
 0x3e4   : > { %3712 = vsyncadd (!%p3622_p2), %s3089_s29, 4294967040  ;;  %p14_p3 = scmp.ge.s32.totalorder %s3785_s21, 4   ;;  %s4270_s15 = smov %s3719_s16 }
 0x3e5   : > { %s4271_s16 = smov %s3723_s17  ;;  %s4272_s17 = smov %s3796_s24 }
 0x3e6   : > { %s4273_s18 = smov %s3785_s21  ;;  %16 = sbr.rel (!%p14_p3) target bundleno = 3 (0x3), region = 74 }
 0x3ed   :  { %3094 = vsyncpa [#allocation3], 1 }
 0x3ee   :  { %3096 = vsyncpa [#allocation3 + $0x1], 1 }

</bundles_post_ra>
